<compile_context>
chip_gen: v7x
topology: tpu7x:2x2x1
jax: 0.10.0
libtpu: 0.0.40
codegen_flags: <defaults>
</compile_context>

<pallas_src>
import jax
import jax.numpy as jnp
from jax.experimental import pallas as pl
from jax.experimental.pallas import tpu as pltpu


def _ceil_div(a, b):
    return -(-a // b)


def _round_up(a, m):
    return _ceil_div(a, m) * m


def _neuralf_kernel(s_ref, x_ref, w1_ref, b1_ref, w2_ref, o_ref):
    """One (2, tb) batch tile; batch lives on the lane axis (lane-dense I/O).

    s_ref : SMEM (1, 3) f32 = [sin(20*t), b2[0], b2[1]]
    x_ref : VMEM (2, tb)
    w1_ref: VMEM (W, 2), b1_ref: VMEM (W, 1), w2_ref: VMEM (2, W)
            (constant index_maps -> fetched once, VMEM-resident across steps)
    o_ref : VMEM (2, tb)
    """
    x0 = x_ref[0:1, :]                                   # (1, tb)
    x1 = x_ref[1:2, :]                                   # (1, tb)
    w1 = w1_ref[...]                                     # (W, 2)
    # Layer 1 (K=2 contraction): two broadcast FMAs on the VPU + tanh on the EUP.
    h = jnp.tanh(w1[:, 0:1] * x0 + w1[:, 1:2] * x1 + b1_ref[...])    # (W, tb)
    # Layer 2 (reduce over W): single matmul on the otherwise-idle MXU.
    z = jnp.dot(w2_ref[...], h, preferred_element_type=jnp.float32)  # (2, tb)
    scale = s_ref[0, 0]                                  # sin(20*t)
    # Direct row stores: no sublane-axis concatenate / relayout.
    o_ref[0:1, :] = (jnp.tanh(z[0:1, :] + s_ref[0, 1]) * scale).astype(o_ref.dtype)
    o_ref[1:2, :] = (jnp.tanh(z[1:2, :] + s_ref[0, 2]) * scale).astype(o_ref.dtype)


def _pick_tile(batch, block_b):
    tb = min(int(block_b), _round_up(batch, 128))
    tb = max(128, _round_up(tb, 128))
    # Keep >= 2 grid steps when there is enough work so the "parallel" batch
    # axis can be split across v7x's two TensorCores.
    if batch > 128 and _ceil_div(batch, tb) < 2:
        tb = _round_up(_ceil_div(batch, 2), 128)
    return tb


def neural_f_channels_first(t, xt, w1, b1, w2, b2, *, block_b=1024):
    """Core Pallas forward in channels-first layout (zero wrapper relayouts).

    xt: (2, B) float32.  Returns (2, B):
        tanh(w2 @ tanh(w1 @ x + b1) + b2) * sin(20*t)   (columnwise per batch elem)
    Weights use torch nn.Linear layouts: w1 (W, 2), b1 (W,), w2 (2, W), b2 (2,).
    """
    _, B = xt.shape
    W = w1.shape[0]
    tb = _pick_tile(B, block_b)
    grid = _ceil_div(B, tb)          # partial last tile is masked by Pallas

    t32 = jnp.asarray(t, jnp.float32)
    consts = jnp.concatenate(
        [jnp.sin(t32 * 20.0).reshape(1), b2.astype(jnp.float32).reshape(2)]
    ).reshape(1, 3)                  # [sin(20t), b2_0, b2_1], computed once

    w1k = w1.astype(jnp.float32)                  # (W, 2)
    b1k = b1.astype(jnp.float32).reshape(W, 1)    # (W, 1)
    w2k = w2.astype(jnp.float32)                  # (2, W)  (native torch layout)

    return pl.pallas_call(
        _neuralf_kernel,
        out_shape=jax.ShapeDtypeStruct((2, B), jnp.float32),
        grid=(grid,),
        in_specs=[
            # sin(20*t) and b2: tiny SMEM scalar block, same every step.
            pl.BlockSpec((1, 3), lambda i: (0, 0),
                         memory_space=pltpu.MemorySpace.SMEM),
            # x streams along the batch grid (lane-dense tiles).
            pl.BlockSpec((2, tb), lambda i: (0, i)),
            # Weights/bias: constant index_map -> fetched once, VMEM-resident.
            pl.BlockSpec((W, 2), lambda i: (0, 0)),
            pl.BlockSpec((W, 1), lambda i: (0, 0)),
            pl.BlockSpec((2, W), lambda i: (0, 0)),
        ],
        out_specs=pl.BlockSpec((2, tb), lambda i: (0, i)),
        compiler_params=pltpu.CompilerParams(
            dimension_semantics=("parallel",),
        ),
    )(consts, xt.astype(jnp.float32), w1k, b1k, w2k)


def neural_f(t, x, w1, b1, w2, b2, *, block_b=1024):
    """Torch-layout entry point: x (B, 2) -> (B, 2).

    Callers that already hold a (2, B) layout should use
    neural_f_channels_first() directly and skip both transposes below.
    """
    out_t = neural_f_channels_first(t, x.astype(jnp.float32).T,
                                    w1, b1, w2, b2, block_b=block_b)
    return out_t.T


def init_params(key, width):
    """torch.nn.Linear-style init/layouts: uniform +-1/sqrt(fan_in)."""
    k1, k2, k3, k4 = jax.random.split(key, 4)
    bound1 = 1.0 / jnp.sqrt(2.0)       # fan_in = 2
    bound2 = 1.0 / jnp.sqrt(width)     # fan_in = width
    w1 = jax.random.uniform(k1, (width, 2), jnp.float32, -bound1, bound1)  # (out, in)
    b1 = jax.random.uniform(k2, (width,), jnp.float32, -bound1, bound1)
    w2 = jax.random.uniform(k3, (2, width), jnp.float32, -bound2, bound2)  # (out, in)
    b2 = jax.random.uniform(k4, (2,), jnp.float32, -bound2, bound2)
    return w1, b1, w2, b2


if __name__ == "__main__":
    key = jax.random.PRNGKey(0)
    kx, kp = jax.random.split(key)

    width = 32
    batch = 200   # not a multiple of 128: exercises the partial last tile + 2-step grid
    x = jax.random.normal(kx, (batch, 2), jnp.float32)
    t = jnp.float32(0.37)
    w1, b1, w2, b2 = init_params(kp, width)

    out = neural_f(t, x, w1, b1, w2, b2, block_b=1024)
    out = jax.block_until_ready(out)

    # Pure-JAX reference of the same math (torch layouts: y = x @ W.T + b).
    hp = jax.lax.Precision.HIGHEST
    h_ref = jnp.tanh(jnp.dot(x, w1.T, precision=hp) + b1)
    ref = jnp.tanh(jnp.dot(h_ref, w2.T, precision=hp) + b2) * jnp.sin(t * 20.0)

    assert out.shape == (batch, 2)
    assert jnp.allclose(out, ref, atol=1e-4, rtol=1e-4), \
        float(jnp.max(jnp.abs(out - ref)))

    # TODO(synk): the PyTorch module's `self.nfe` call counter is host-side
    # mutable Python state and is intentionally kept outside the kernel.
    print("KERNEL_OK")
</pallas_src>

<mosaic_0001>
module attributes {stable_mosaic.version = 11 : i64} {
  func.func @_neuralf_kernel(%arg0: i32, %arg1: memref<1x3xf32, #tpu.memory_space<smem>>, %arg2: memref<2x128xf32, #tpu.memory_space<vmem>>, %arg3: memref<32x2xf32, #tpu.memory_space<vmem>>, %arg4: memref<32x1xf32, #tpu.memory_space<vmem>>, %arg5: memref<2x32xf32, #tpu.memory_space<vmem>>, %arg6: memref<2x128xf32, #tpu.memory_space<vmem>>) attributes {dimension_semantics = [#tpu.dimension_semantics<parallel>], iteration_bounds = array<i64: 2>, scalar_prefetch = 0 : i64, scratch_operands = 0 : i64, tpu.core_type = #tpu.core_type<tc>, window_params = [{transform_indices = @transform_0, window_bounds = array<i64: 1, 3>}, {transform_indices = @transform_1, window_bounds = array<i64: 2, 128>}, {pipeline_mode = #tpu.pipeline_mode<synchronous>, transform_indices = @transform_2, window_bounds = array<i64: 32, 2>}, {pipeline_mode = #tpu.pipeline_mode<synchronous>, transform_indices = @transform_3, window_bounds = array<i64: 32, 1>}, {pipeline_mode = #tpu.pipeline_mode<synchronous>, transform_indices = @transform_4, window_bounds = array<i64: 2, 32>}, {transform_indices = @transform_5, window_bounds = array<i64: 2, 128>}]} {
    %c0 = arith.constant 0 : index
    %c0_0 = arith.constant 0 : index
    %0 = vector.load %arg2[%c0, %c0_0] : memref<2x128xf32, #tpu.memory_space<vmem>>, vector<1x128xf32>
    %c1 = arith.constant 1 : index
    %c0_1 = arith.constant 0 : index
    %1 = vector.load %arg2[%c1, %c0_1] : memref<2x128xf32, #tpu.memory_space<vmem>>, vector<1x128xf32>
    %c0_2 = arith.constant 0 : index
    %c0_3 = arith.constant 0 : index
    %2 = vector.load %arg3[%c0_2, %c0_3] : memref<32x2xf32, #tpu.memory_space<vmem>>, vector<32x2xf32>
    %3 = vector.extract_strided_slice %2 {offsets = [0, 0], sizes = [32, 1], strides = [1, 1]} : vector<32x2xf32> to vector<32x1xf32>
    %4 = vector.broadcast %3 : vector<32x1xf32> to vector<32x128xf32>
    %5 = vector.broadcast %0 : vector<1x128xf32> to vector<32x128xf32>
    %6 = arith.mulf %4, %5 : vector<32x128xf32>
    %7 = vector.extract_strided_slice %2 {offsets = [0, 1], sizes = [32, 1], strides = [1, 1]} : vector<32x2xf32> to vector<32x1xf32>
    %8 = vector.broadcast %7 : vector<32x1xf32> to vector<32x128xf32>
    %9 = vector.broadcast %1 : vector<1x128xf32> to vector<32x128xf32>
    %10 = arith.mulf %8, %9 : vector<32x128xf32>
    %11 = arith.addf %6, %10 : vector<32x128xf32>
    %c0_4 = arith.constant 0 : index
    %c0_5 = arith.constant 0 : index
    %12 = vector.load %arg4[%c0_4, %c0_5] : memref<32x1xf32, #tpu.memory_space<vmem>>, vector<32x1xf32>
    %13 = vector.broadcast %12 : vector<32x1xf32> to vector<32x128xf32>
    %14 = arith.addf %11, %13 : vector<32x128xf32>
    %15 = math.tanh %14 : vector<32x128xf32>
    %c0_6 = arith.constant 0 : index
    %c0_7 = arith.constant 0 : index
    %16 = vector.load %arg5[%c0_6, %c0_7] : memref<2x32xf32, #tpu.memory_space<vmem>>, vector<2x32xf32>
    %cst = arith.constant dense<0.000000e+00> : vector<2x128xf32>
    %17 = tpu.matmul %16, %15, %cst {dimension_numbers = #tpu.dot_dimension_numbers<[1], [0], [0], [1], [0, 0, 1, 1], [], []>} : vector<2x32xf32>, vector<32x128xf32>, vector<2x128xf32> -> vector<2x128xf32>
    %c0_8 = arith.constant 0 : index
    %c0_9 = arith.constant 0 : index
    %18 = memref.load %arg1[%c0_8, %c0_9] : memref<1x3xf32, #tpu.memory_space<smem>>
    %19 = vector.extract_strided_slice %17 {offsets = [0, 0], sizes = [1, 128], strides = [1, 1]} : vector<2x128xf32> to vector<1x128xf32>
    %c0_10 = arith.constant 0 : index
    %c1_11 = arith.constant 1 : index
    %20 = memref.load %arg1[%c0_10, %c1_11] : memref<1x3xf32, #tpu.memory_space<smem>>
    %21 = vector.broadcast %20 : f32 to vector<1x128xf32>
    %22 = arith.addf %19, %21 : vector<1x128xf32>
    %23 = math.tanh %22 : vector<1x128xf32>
    %24 = vector.broadcast %18 : f32 to vector<1x128xf32>
    %25 = arith.mulf %23, %24 : vector<1x128xf32>
    %c0_12 = arith.constant 0 : index
    %c0_13 = arith.constant 0 : index
    %26 = vector.load %arg6[%c0_12, %c0_13] : memref<2x128xf32, #tpu.memory_space<vmem>>, vector<1x128xf32>
    tpu.vector_store %arg6[%c0_12, %c0_13], %25 {strides = array<i32>} : memref<2x128xf32, #tpu.memory_space<vmem>>, vector<1x128xf32>,
    %27 = vector.extract_strided_slice %17 {offsets = [1, 0], sizes = [1, 128], strides = [1, 1]} : vector<2x128xf32> to vector<1x128xf32>
    %c0_14 = arith.constant 0 : index
    %c2 = arith.constant 2 : index
    %28 = memref.load %arg1[%c0_14, %c2] : memref<1x3xf32, #tpu.memory_space<smem>>
    %29 = vector.broadcast %28 : f32 to vector<1x128xf32>
    %30 = arith.addf %27, %29 : vector<1x128xf32>
    %31 = math.tanh %30 : vector<1x128xf32>
    %32 = vector.broadcast %18 : f32 to vector<1x128xf32>
    %33 = arith.mulf %31, %32 : vector<1x128xf32>
    %c1_15 = arith.constant 1 : index
    %c0_16 = arith.constant 0 : index
    %34 = vector.load %arg6[%c1_15, %c0_16] : memref<2x128xf32, #tpu.memory_space<vmem>>, vector<1x128xf32>
    tpu.vector_store %arg6[%c1_15, %c0_16], %33 {strides = array<i32>} : memref<2x128xf32, #tpu.memory_space<vmem>>, vector<1x128xf32>,
    return
  }
  func.func @transform_0(%arg0: i32) -> (i32, i32) {
    %c0_i32 = arith.constant 0 : i32
    %c0_i32_0 = arith.constant 0 : i32
    %c0_i32_1 = arith.constant 0 : i32
    return %c0_i32, %c0_i32_0 : i32, i32
  }
  func.func @transform_1(%arg0: i32) -> (i32, i32) {
    %c0_i32 = arith.constant 0 : i32
    %c0_i32_0 = arith.constant 0 : i32
    return %c0_i32, %arg0 : i32, i32
  }
  func.func @transform_2(%arg0: i32) -> (i32, i32) {
    %c0_i32 = arith.constant 0 : i32
    %c0_i32_0 = arith.constant 0 : i32
    %c0_i32_1 = arith.constant 0 : i32
    return %c0_i32, %c0_i32_0 : i32, i32
  }
  func.func @transform_3(%arg0: i32) -> (i32, i32) {
    %c0_i32 = arith.constant 0 : i32
    %c0_i32_0 = arith.constant 0 : i32
    %c0_i32_1 = arith.constant 0 : i32
    return %c0_i32, %c0_i32_0 : i32, i32
  }
  func.func @transform_4(%arg0: i32) -> (i32, i32) {
    %c0_i32 = arith.constant 0 : i32
    %c0_i32_0 = arith.constant 0 : i32
    %c0_i32_1 = arith.constant 0 : i32
    return %c0_i32, %c0_i32_0 : i32, i32
  }
  func.func @transform_5(%arg0: i32) -> (i32, i32) {
    %c0_i32 = arith.constant 0 : i32
    %c0_i32_0 = arith.constant 0 : i32
    return %c0_i32, %arg0 : i32, i32
  }
}

</mosaic_0001>

<bundles_post_ra>
// kernel: tpu_custom_call.1
= control target key start
LH: loop header
LB: loop body
LE: loop exit
PB: predicated region body
PF: predicated region fallthrough
CT: control target
= control target key end

     0   :  { %10 = vsyncpa [#allocation4], 0  ;;  %s879_s0 = inlined_call_operand.vmem [shape: f32[1,3], index: 0, kind: input, shape index: {}]   ;;  %s880_s1 = inlined_call_operand.vmem [shape: f32[2,200], index: 1, kind: input, shape index: {}]   ;;  %s881_s2 = inlined_call_operand.vmem [shape: f32[32,2], index: 2, kind: input, shape index: {}]   ;;  %s882_s3 = inlined_call_operand.vmem [shape: f32[32,1], index: 3, kind: input, shape index: {}]   ;;  %s883_s4 = inlined_call_operand.vmem [shape: f32[2,32], index: 4, kind: input, shape index: {}]   ;;  %s884_s5 = inlined_call_operand.hbm [shape: f32[2,200], index: 5, kind: output, shape index: {}]  }
   0x1   :  { %11 = vsyncpa [#allocation3], 0 }
   0x2   :  { %13 = vsyncpa [#allocation3 + $0x1], 0  ;;  %s734_s18 = smov 0   ;;  %s736_s19 = smov 0  }
   0x3   :  { %s738_s20 = smov 0   ;;  %s740_s21 = smov 0  }
   0x4 LB: > { %s755_s22 = sadd.s32 4294967295, %s695_s21   ;;  %s502_s23 = sadd.s32 4294967294, %s695_s21   ;;  %s695_s21 = sphi %s740_s21, %s891_s21   ;;  %s691_s20 = sphi %s738_s20, %s890_s20   ;;  %s687_s19 = sphi %s736_s19, %s889_s19   ;;  %s683_s18 = sphi %s734_s18, %s888_s18  }
   0x5   : > { %s759_s24 = sadd.s32 1, %s695_s21   ;;  %s136_s25 = sadd.s32 1, %s691_s20 }
   0x6   : > { %s133_s26 = ssub.s32 %s695_s21, %s759_s24  ;;  %p146_p0 = scmp.ne.s32.totalorder %s691_s20, %s687_s19 }
   0x7   : > { %p134_p1 = scmp.eq.s32.totalorder %s133_s26, 0  ;;  %p147_p2 = scmp.eq.s32.totalorder %s755_s22, 1 }
   0x8   : > { %p152_p3 = scmp.ne.s32.totalorder %s687_s19, %s683_s18  ;;  %p153_p4 = scmp.eq.s32.totalorder %s502_s23, 1 }
   0x9   : > { %s770_s27 = scalar_select %p134_p1, %s691_s20, %s136_s25  }
   0xa   : > { %p772_p5 = por %p147_p2, %p146_p0  ;;  %p776_p6 = por %p153_p4, %p152_p3 }
   0xb   : > { %p503_p7 = scmp.ge.s32.totalorder %s695_s21, 1  ;;  %p160_p8 = scmp.lt.s32.totalorder %s695_s21, 3 }
   0xc   : > { %p555_p9 = scmp.eq.s32.totalorder %s755_s22, 0  ;;  %s173_s8 = sshll.u32 %s879_s0, 4  ;;  %s174_s8 = int_to_ptr.vmem [resolvable:$true] %s173_s8 }
   0xd   : > { %p783_p10 = pnand %p503_p7, %p160_p8  ;;  %s614_s9 = scalar_lea.vmem %s174_s8, 16 }
   0xe   : > { %p615_p13 = scmp.ne.s32.totalorder %s174_s8, %s614_s9  ;;  %p622_p3 = scmp.lt.s32.totalorder %s174_s8, %s174_s8 }
   0xf   : > { %p547_p11 = pneg %p783_p10  ;;  %p623_p4 = scmp.lt.s32.totalorder %s614_s9, %s614_s9 }
  0x11   : > { %p548_p12 = pnand %p555_p9, %p547_p11  ;;  %p624_p7 = por %p623_p4, %p622_p3 }
  0x13   : > { %p616_p0 = pneg %p548_p12 }
  0x15   : > { %p617_p1 = pnand %p616_p0, %p615_p13 }
  0x17   : > { %p618_p2 = pneg %p617_p1 }
  0x19   : > { %p625_p8 = pnand %p624_p7, %p618_p2 }
  0x1b   : > { %628 = shalt.err (!%p625_p8)
}
  0x1c   : > { %s697_s10 = smov [#allocation2]   ;;  %202 = sbr.rel (%p783_p10) target bundleno = 455 (0x1c7), region = 40 }
  0x1d   : > { %550 = dma.vmem_to_smem (!%p548_p12), %s174_s8, 16, %s697_s10, [#allocation4]  }
  0x23   : > { %674 = dma.done.wait (%p555_p9), [#allocation4], 16  }
  0x24   : > { %676 = vsyncadd (%p555_p9), [#allocation4], 4294967280 }
  0x25   : > { %208 = sfence }
  0x26   : > { %v238_v0 = vld [vmem:[%s881_s2 + $0x10] sm:$0xff]  ;;  %v236_v1 = vld [vmem:[%s881_s2] sm:$0xff]  ;;  %v698_v2 = vmov 1   ;;  %v237_v3 = vld [vmem:[%s881_s2 + $0x8] sm:$0xff]  ;;  %v699_v4 = vmov 0   ;;  %v700_v10 = vmov 0.0|0.0  }
  0x27   : > { %598 = vset.pattern.permute.xlu0 %v698_v2  ;;  %596 = vset.pattern.permute.xlu1 %v698_v2  ;;  %v239_v5 = vld [vmem:[%s881_s2 + $0x18] sm:$0xff]  ;;  %v297_v6 = vld [vmem:[%s882_s3 + $0x8] sm:$0xff]  ;;  %v296_v7 = vld [vmem:[%s882_s3] sm:$0xff]  ;;  %vm701_vm0 = vmmov 0   ;;  %v702_v11 = vmov 0.0   ;;  %p230_p9 = scmp.lt.s32.totalorder %s755_s22, 1 }
  0x28   : > { %277 = vperm.xlu0 %598, %v238_v0   ;;  %269 = vperm.xlu1 %596, %v236_v1   ;;  %v298_v8 = vld [vmem:[%s882_s3 + $0x10] sm:$0xff]  ;;  %v299_v9 = vld [vmem:[%s882_s3 + $0x18] sm:$0xff]  ;;  %v328_v48 = vld [vmem:[%s883_s4] sm:$0x3]  ;;  %vm329_vm1 = vcmask 261120   ;;  %s513_s23 = sld [smem:[#allocation2 + $0x1]] }
  0x29   : > { %535 = vmatprep.subr.bf16.mxu0 %v700_v10  ;;  %532 = vmatprep.mubr.msk.f32.mxu0 %vm701_vm0, %v702_v11  ;;  %s231_s11 = scalar_select %p230_p9, %s755_s22, 1 }
  0x2a   : > { %s514_s25 = sld [smem:[#allocation2 + $0x2]]  ;;  %s227_s26 = sand.u32 1, %s687_s19  }
  0x2b   : > { %s509_s12 = sshll.u32 %s231_s11, 1  ;;  %s403_s30 = sld [smem:[#allocation2]] }
  0x2c   : > { %599 = vset.pattern.permute.xlu0 %v699_v4  ;;  %273 = vperm.xlu1 %596, %v237_v3   ;;  %s233_s15 = scalar_lea.vmem %s880_s1, %s509_s12  ;;  %s508_s6 = sshll.u32 %s227_s26, 1 }
  0x2d   : > { %242 = vperm.xlu0 %599, %v236_v1   ;;  %v510_v18 = vld [vmem:[%s233_s15] ss:$0 sm:$0xff]  ;;  %v511_v20 = vld [vmem:[%s233_s15 + $0x1] ss:$0 sm:$0xff]  ;;  %s516_s7 = sshll.u32 %s755_s22, 5  ;;  %s229_s8 = scalar_lea.vmem [#allocation5], %s508_s6 }
  0x2e   : > { %v405_v49 = vstv %s513_s23  ;;  %s431_s9 = sshll.u32 %s229_s8, 4  ;;  %s837_s12 = scalar_lea.hbm %s884_s5, %s516_s7  ;;  %s839_s9 = int_to_ptr.vmem [resolvable:$true] %s431_s9 }
  0x2f   : > { %s418_s13 = scalar_lea.sflag [#allocation3], %s227_s26  ;;  %s629_s22 = scalar_lea.vmem %s839_s9, 32 }
  0x30   : > { %597 = vset.pattern.permute.xlu1 %v699_v4  ;;  %v412_v50 = vstv %s514_s25  ;;  %p630_p10 = scmp.ne.s32.totalorder %s839_s9, %s629_s22  ;;  %s703_s14 = smov [#allocation5]  }
  0x31   : > { %247 = vperm.xlu0 %599, %v237_v3   ;;  %257 = vperm.xlu1 %597, %v239_v5   ;;  %v408_v55 = vstv %s403_s30  ;;  %s633_s15 = sshll.u32 %s703_s14, 4  ;;  %s634_s15 = int_to_ptr.vmem [resolvable:$false] %s633_s15 }
  0x32   : > { %p631_p11 = pnand %p630_p10, %p772_p5  ;;  %s635_s16 = scalar_lea.vmem %s634_s15, 64 }
  0x33   : > { %p636_p13 = scmp.lt.s32.totalorder %s839_s9, %s634_s15  ;;  %p637_p0 = scmp.lt.s32.totalorder %s635_s16, %s629_s22 }
  0x34   : > { %p632_p12 = pneg %p631_p11 }
  0x35   : > { %252 = vperm.xlu0 %599, %v238_v0   ;;  %600 = vset.pattern.permute.xlu1 %v698_v2  ;;  %p638_p1 = por %p637_p0, %p636_p13 }
  0x36   : > { %281 = vperm.xlu1 %600, %v239_v5  }
  0x37   : > { %p639_p2 = pnand %p638_p1, %p632_p12 }
  0x39   : > { %307 = vperm.xlu0 %599, %v297_v6  }
  0x3a   : > { %601 = vset.pattern.permute.xlu1 %v699_v4 }
  0x3b   : > { %302 = vperm.xlu1 %601, %v296_v7  }
  0x3f   : > { %312 = vperm.xlu1 %601, %v298_v8  }
  0x43   : > { %317 = vperm.xlu1 %601, %v299_v9  }
  0xa7   : > { %v270_v12 = vpop.permute.xlu1 %269  ;;  %v278_v13 = vpop.permute.xlu0 %277 }
  0xa8   : > { %v288_v25 = vmul.f32 %v511_v20, %v270_v12  ;;  %v290_v33 = vmul.f32 %v511_v20, %v278_v13 }
  0xab   : > { %v274_v14 = vpop.permute.xlu1 %273 }
  0xac   : > { %v243_v15 = vpop.permute.xlu0 %242  ;;  %v289_v22 = vmul.f32 %v511_v20, %v274_v14 }
  0xad   : > { %v264_v23 = vmul.f32 %v510_v18, %v243_v15 }
  0xaf   : > { %v292_v29 = vadd.f32 %v288_v25, %v264_v23 }
  0xb0   : > { %v248_v16 = vpop.permute.xlu0 %247  ;;  %v258_v17 = vpop.permute.xlu1 %257 }
  0xb1   : > { %v265_v19 = vmul.f32 %v510_v18, %v248_v16  ;;  %v267_v37 = vmul.f32 %v510_v18, %v258_v17 }
  0xb3   : > { %v293_v26 = vadd.f32 %v289_v22, %v265_v19 }
  0xb4   : > { %v253_v21 = vpop.permute.xlu0 %252 }
  0xb5   : > { %v282_v24 = vpop.permute.xlu1 %281  ;;  %v266_v30 = vmul.f32 %v510_v18, %v253_v21 }
  0xb6   : > { %v291_v34 = vmul.f32 %v511_v20, %v282_v24 }
  0xb7   : > { %v294_v36 = vadd.f32 %v290_v33, %v266_v30 }
  0xb8   : > { %v308_v27 = vpop.permute.xlu0 %307  ;;  %v295_v39 = vadd.f32 %v291_v34, %v267_v37 }
  0xb9   : > { %v321_v28 = vadd.f32 %v308_v27, %v293_v26 }
  0xba   : > { %v303_v31 = vpop.permute.xlu1 %302 }
  0xbb   : > { %v320_v32 = vadd.f32 %v303_v31, %v292_v29  ;;  %602 = vtanh.f32 %v321_v28 }
  0xbd   : > { %604 = vtanh.f32 %v320_v32 }
  0xbe   : > { %v313_v35 = vpop.permute.xlu1 %312 }
  0xbf   : > { %v322_v38 = vadd.f32 %v313_v35, %v294_v36 }
  0xc1   : > { %606 = vtanh.f32 %v322_v38 }
  0xc2   : > { %v318_v40 = vpop.permute.xlu1 %317 }
  0xc3   : > { %v323_v41 = vadd.f32 %v318_v40, %v295_v39 }
  0xc5   : > { %608 = vtanh.f32 %v323_v41  ;;  %v603_v42 = vpop.eup %602 }
  0xc7   : > { %v605_v43 = vpop.eup %604 }
  0xc8   : > { %v536_v44 = vpack.c.bf16 %v603_v42, %v605_v43 }
  0xca   : > { %537 = vmatpush3.bf16.msra.mxu0 %v536_v44 }
  0xcb   : > { %538 = vmatprep.subr.bf16.mxu0 %v700_v10  ;;  %v607_v45 = vpop.eup %606 }
  0xcf   : > { %v609_v46 = vpop.eup %608 }
  0xd0   : > { %v539_v47 = vpack.c.bf16 %v609_v46, %v607_v45 }
  0xd2   : > { %540 = vmatpush3.bf16.msra.mxu0 %v539_v47 }
  0xd5   : > { %533 = vmatmul.mubr.msk.f32.vlgmr.msra.gmra.mrb[0].mxu0 %vm329_vm1, %v328_v48 }
 0x1a8   : > { %v399_v51 = vpop.f32.mrb[0].mxu0 }
 0x1a9   : > { %v406_v52 = vadd.f32 %v405_v49, %v399_v51  ;;  %v413_v53 = vadd.f32 %v412_v50, %v399_v51  ;;  %v534_v54 = vpop.f32.mrb[1].mxu0 }
 0x1ab   : > { %610 = vtanh.f32 %v406_v52 }
 0x1ac   : > { %612 = vtanh.f32 %v413_v53 }
 0x1b5   : > { %v611_v56 = vpop.eup %610 }
 0x1b6   : > { %v613_v57 = vpop.eup %612  ;;  %v409_v58 = vmul.f32 %v611_v56, %v408_v55 }
 0x1b7   : > { %v415_v59 = vmul.f32 %v613_v57, %v408_v55 }
 0x1b8   : > { %410 = vst [vmem:[%s229_s8] sm:$0x1] %v409_v58 }
 0x1b9   : > { %416 = vst [vmem:[%s229_s8] sm:$0x2] %v415_v59 }
 0x1ba   : > { %642 = shalt.err (!%p639_p2)
}
 0x1bb   : > { %s643_s17 = scalar_lea.hbm %s837_s12, 32  ;;  %s647_s26 = scalar_lea.hbm %s884_s5, 64 }
 0x1bc   : > { %p644_p3 = scmp.ne.s32.totalorder %s837_s12, %s643_s17  ;;  %p648_p8 = scmp.lt.u32.totalorder %s837_s12, %s884_s5 }
 0x1bd   : > { %p649_p9 = scmp.lt.u32.totalorder %s647_s26, %s643_s17  ;;  %p651_p11 = scmp.lt.u32.totalorder %s643_s17, %s837_s12 }
 0x1be   : > { %p645_p4 = pnand %p644_p3, %p772_p5 }
 0x1bf   : > { %p650_p10 = por %p649_p9, %p648_p8 }
 0x1c0   : > { %p646_p7 = pneg %p645_p4 }
 0x1c1   : > { %p652_p12 = por %p651_p11, %p650_p10 }
 0x1c3   : > { %p653_p13 = pnand %p652_p12, %p646_p7 }
 0x1c5   : > { %656 = shalt.err (!%p653_p13)
}
 0x1c6   : > { %545 = dma.vmem_to_hbm [thread:$0]  (%p772_p5), %s839_s9, 32, %s837_s12, %s418_s13  }
 0x1c7 PF: > { %p557_p0 = scmp.ge.s32.totalorder %s695_s21, 2  ;;  %s443_s7 = sand.u32 1, %s683_s18  }
 0x1c8   : > { %s444_s8 = scalar_lea.sflag [#allocation3], %s443_s7 }
 0x1c9   : > { %p552_p1 = pnand %p557_p0, %p776_p6 }
 0x1cb   : > { %678 = dma.done.wait (!%p552_p1), %s444_s8, 32  }
 0x1cc   : > { %680 = vsyncadd (!%p552_p1), %s444_s8, 4294967264  ;;  %p16_p2 = scmp.ge.s32.totalorder %s759_s24, 4   ;;  %s888_s18 = smov %s687_s19 }
 0x1cd   : > { %s889_s19 = smov %s691_s20  ;;  %s890_s20 = smov %s770_s27 }
 0x1ce   : > { %s891_s21 = smov %s759_s24  ;;  %18 = sbr.rel (!%p16_p2) target bundleno = 4 (0x4), region = 80 }
 0x1d5   :  { %449 = vsyncpa [#allocation3], 1 }
 0x1d6   :  { %451 = vsyncpa [#allocation3 + $0x1], 1 }
 0x1d7   :  { %452 = vsyncpa [#allocation4], 1 }
 0x1d8   :  { %454 = vsyncpa [#allocation4 + $0x1], 1 }

</bundles_post_ra>
